<compile_context>
chip_gen: v7x
topology: tpu7x:2x2x1
jax: 0.10.0
libtpu: 0.0.40
codegen_flags: <defaults>
</compile_context>

<pallas_src>
import functools

import jax
import jax.numpy as jnp
from jax.experimental import pallas as pl
from jax.experimental.pallas import tpu as pltpu

KH, KW = 7, 7
PAD = 3
IN_CH = 2   # max-map + mean-map


# --------------------------------------------------------------------------- #
# Kernel helpers (shared by both conv formulations)
# --------------------------------------------------------------------------- #
def _chunk_channels(C, ct=8):
    """Static channel-chunk sizes: full 8-sublane chunks plus a remainder."""
    chunks = [ct] * (C // ct)
    if C % ct:
        chunks.append(C % ct)
    return tuple(chunks)


def _reduce_channels(x_ref, chunks):
    """Channel max / sum over the (Bt, C, HW) block, streamed 8 channels at a
    time so every VPU op works on (near-)full 8-sublane operands."""
    c0 = 0
    p_max = None
    p_sum = None
    for ct in chunks:
        chunk = x_ref[:, c0:c0 + ct, :].astype(jnp.float32)      # (Bt, ct, HW)
        cmax = jnp.max(chunk, axis=1)                            # (Bt, HW)
        csum = jnp.sum(chunk, axis=1)
        if p_max is None:
            p_max, p_sum = cmax, csum
        else:
            p_max = jnp.maximum(p_max, cmax)
            p_sum = p_sum + csum
        c0 += ct
    return p_max, p_sum


def _apply_attn(attn, x_ref, o_ref, chunks):
    """o[:, c, :] = attn * x[:, c, :], streamed in 8-channel chunks so stores
    are full-width (important on v5e's single vst slot)."""
    c0 = 0
    for ct in chunks:
        chunk = x_ref[:, c0:c0 + ct, :].astype(jnp.float32)      # (Bt, ct, HW)
        o_ref[:, c0:c0 + ct, :] = (attn[:, None, :] * chunk).astype(o_ref.dtype)
        c0 += ct


# --------------------------------------------------------------------------- #
# Primary kernel: conv as one MXU matmul
# --------------------------------------------------------------------------- #
def sa_kernel_mxu(m_ref, b_ref, x_ref, o_ref, *, chunks):
    """One grid step over Bt batch elements.

    m_ref: (2*HW, HW) VMEM -- conv weights * pad-mask (max rows | mean/C rows)
    b_ref: (1,)       SMEM -- conv bias
    x_ref: (Bt, C, HW) VMEM input block (lane-dense minor dim)
    o_ref: (Bt, C, HW) VMEM output block
    """
    p_max, p_sum = _reduce_channels(x_ref, chunks)               # 2 x (Bt, HW)
    planes = jnp.concatenate([p_max, p_sum], axis=-1)            # (Bt, 2*HW)
    acc = jnp.dot(planes, m_ref[...], preferred_element_type=jnp.float32)
    attn = jnp.maximum(acc + b_ref[0], 0.0)                      # ReLU, (Bt, HW)
    _apply_attn(attn, x_ref, o_ref, chunks)


# --------------------------------------------------------------------------- #
# Fallback kernel: conv via 49 static lane-rolls (for large HW where the
# (2*HW, HW) matmul table would not fit VMEM)
# --------------------------------------------------------------------------- #
def sa_kernel_roll(wm_max_ref, wm_sum_ref, b_ref, x_ref, o_ref, *, shifts, chunks):
    Bt = x_ref.shape[0]
    p_max, p_sum = _reduce_channels(x_ref, chunks)

    # 4 independent accumulators break the 49-long serial add dependency.
    accs = [jnp.full(p_max.shape, b_ref[0], dtype=jnp.float32),
            jnp.zeros(p_max.shape, dtype=jnp.float32),
            jnp.zeros(p_max.shape, dtype=jnp.float32),
            jnp.zeros(p_max.shape, dtype=jnp.float32)]
    for k, shift in enumerate(shifts):
        rm = p_max if shift == 0 else pltpu.roll(p_max, shift=shift, axis=1)
        rs = p_sum if shift == 0 else pltpu.roll(p_sum, shift=shift, axis=1)
        if Bt == 1:
            wmax = wm_max_ref[k:k + 1, :]
            wsum = wm_sum_ref[k:k + 1, :]
        else:
            # Stride-0 sublane-broadcast load: the vld delivers row k already
            # replicated to Bt sublanes (no per-tap broadcast_in_dim).
            wmax = wm_max_ref[pl.ds(k, Bt, stride=0), :]
            wsum = wm_sum_ref[pl.ds(k, Bt, stride=0), :]
        accs[k % 4] = accs[k % 4] + rm * wmax + rs * wsum

    attn = jnp.maximum((accs[0] + accs[1]) + (accs[2] + accs[3]), 0.0)
    _apply_attn(attn, x_ref, o_ref, chunks)


# --------------------------------------------------------------------------- #
# Wrapper-side parameter precompute
# --------------------------------------------------------------------------- #
def _build_conv_matmul_table(conv_w, C, H, W):
    """(2*HW, HW) matrix M so that conv(cat(max, mean)) == [maxp|sump] @ M.

    Rows 0..HW-1   : contributions of the max plane (weight * pad mask).
    Rows HW..2HW-1 : contributions of the sum plane (weight/C * pad mask).
    """
    HW = H * W
    h_idx = jnp.arange(HW, dtype=jnp.int32) // W
    w_idx = jnp.arange(HW, dtype=jnp.int32) % W
    cols = jnp.arange(HW, dtype=jnp.int32)
    w_max = conv_w[0, 0].astype(jnp.float32)
    w_sum = conv_w[0, 1].astype(jnp.float32) / C                 # fold mean's 1/C
    M = jnp.zeros((2 * HW, HW), dtype=jnp.float32)
    for dy in range(KH):
        for dx in range(KW):
            src_h = h_idx + (dy - PAD)
            src_w = w_idx + (dx - PAD)
            valid = ((src_h >= 0) & (src_h < H) &
                     (src_w >= 0) & (src_w < W)).astype(jnp.float32)
            src = jnp.clip(src_h, 0, H - 1) * W + jnp.clip(src_w, 0, W - 1)
            M = M.at[src, cols].add(w_max[dy, dx] * valid)
            M = M.at[src + HW, cols].add(w_sum[dy, dx] * valid)
    return M


def _build_roll_tables(conv_w, C, H, W):
    """Per-tap weight*mask tables and static circular-roll amounts."""
    HW = H * W
    h_idx = jnp.arange(HW, dtype=jnp.int32) // W
    w_idx = jnp.arange(HW, dtype=jnp.int32) % W
    mask_rows, shifts = [], []
    for dy in range(KH):
        for dx in range(KW):
            valid = ((h_idx + (dy - PAD) >= 0) & (h_idx + (dy - PAD) < H) &
                     (w_idx + (dx - PAD) >= 0) & (w_idx + (dx - PAD) < W))
            mask_rows.append(valid.astype(jnp.float32))
            s = (dy - PAD) * W + (dx - PAD)
            shifts.append((-s) % HW)
    mask_mat = jnp.stack(mask_rows)                              # (49, HW)
    w_max = conv_w[0, 0].reshape(KH * KW, 1).astype(jnp.float32)
    w_sum = conv_w[0, 1].reshape(KH * KW, 1).astype(jnp.float32) / C
    return mask_mat * w_max, mask_mat * w_sum, tuple(shifts)


def _pick_bt(B, C, HW, *, target_steps=4, budget_bytes=2 * 1024 * 1024):
    """Largest divisor of B that (a) keeps one x+o block under ~budget_bytes so
    double-buffered tiles fit comfortably in VMEM (v7x's 64 MiB included) and
    (b) leaves >= min(target_steps, B) grid steps so the BlockSpec pipeline can
    overlap DMA with compute and v7x can shard the batch axis across cores."""
    per_b = 2 * C * HW * 4                                       # x + o, f32
    cap = max(1, budget_bytes // per_b)
    min_steps = min(target_steps, B)
    bt = 1
    for d in range(1, B + 1):
        if B % d == 0 and d <= cap and (B // d) >= min_steps:
            bt = d
    return bt


# --------------------------------------------------------------------------- #
# Public forward
# --------------------------------------------------------------------------- #
def sa_forward(x, conv_w, conv_b, *, use_mxu=None):
    """x: (B, C, H, W) f32; conv_w: (1, 2, 7, 7); conv_b: (1,)."""
    B, C, H, W = x.shape
    HW = H * W

    x3 = x.reshape(B, C, HW)                                     # lane-dense view
    Bt = _pick_bt(B, C, HW)
    chunks = _chunk_channels(C)
    b_flat = conv_b.reshape(-1).astype(jnp.float32)              # (1,)

    # MXU path unless the (2*HW, HW) table would blow the VMEM budget.
    if use_mxu is None:
        use_mxu = 2 * HW * HW * 4 <= 8 * 1024 * 1024

    if use_mxu:
        M = _build_conv_matmul_table(conv_w, C, H, W)
        kernel = functools.partial(sa_kernel_mxu, chunks=chunks)
        in_specs = [
            pl.BlockSpec((2 * HW, HW), lambda b: (0, 0)),        # M (resident)
            pl.BlockSpec(memory_space=pltpu.MemorySpace.SMEM),   # bias
            pl.BlockSpec((Bt, C, HW), lambda b: (b, 0, 0)),      # x
        ]
        operands = (M, b_flat, x3)
    else:
        wm_max, wm_sum, shifts = _build_roll_tables(conv_w, C, H, W)
        kernel = functools.partial(sa_kernel_roll, shifts=shifts, chunks=chunks)
        in_specs = [
            pl.BlockSpec((KH * KW, HW), lambda b: (0, 0)),       # wm_max
            pl.BlockSpec((KH * KW, HW), lambda b: (0, 0)),       # wm_sum
            pl.BlockSpec(memory_space=pltpu.MemorySpace.SMEM),   # bias
            pl.BlockSpec((Bt, C, HW), lambda b: (b, 0, 0)),      # x
        ]
        operands = (wm_max, wm_sum, b_flat, x3)

    out = pl.pallas_call(
        kernel,
        out_shape=jax.ShapeDtypeStruct((B, C, HW), x.dtype),
        grid_spec=pltpu.PrefetchScalarGridSpec(
            num_scalar_prefetch=0,
            grid=(B // Bt,),
            in_specs=in_specs,
            out_specs=pl.BlockSpec((Bt, C, HW), lambda b: (b, 0, 0)),
        ),
        compiler_params=pltpu.CompilerParams(
            dimension_semantics=("parallel",)),
    )(*operands)

    # TODO(synk): add a C-tiled two-pass path (grid axis over C marked
    # "arbitrary": pass 1 accumulates max/sum, conv+ReLU at the last C step,
    # then a second sweep for attn*x) for shapes where one (Bt, C, HW) block
    # exceeds VMEM (production feature maps, especially v7x's 64 MiB).
    return out.reshape(B, C, H, W)


# --------------------------------------------------------------------------- #
# Pure-JAX reference matching the PyTorch forward
# --------------------------------------------------------------------------- #
def sa_reference(x, conv_w, conv_b):
    x1 = jnp.max(x, axis=1, keepdims=True)
    x2 = jnp.mean(x, axis=1, keepdims=True)
    y = jnp.concatenate([x1, x2], axis=1)
    y = jax.lax.conv_general_dilated(
        y, conv_w, window_strides=(1, 1), padding=[(PAD, PAD), (PAD, PAD)],
        dimension_numbers=("NCHW", "OIHW", "NCHW"))
    y = y + conv_b.reshape(1, 1, 1, 1)
    y = jnp.maximum(y, 0.0)
    return y * x


if __name__ == "__main__":
    key = jax.random.PRNGKey(0)
    kx, kw, kb = jax.random.split(key, 3)

    B, C, H, W = 2, 4, 16, 16
    x = jax.random.normal(kx, (B, C, H, W), dtype=jnp.float32)

    # Deterministic parameter init (Conv2d(2 -> 1, kernel 7x7) + bias).
    conv_w = jax.random.normal(kw, (1, IN_CH, KH, KW), dtype=jnp.float32) * 0.1
    conv_b = jax.random.normal(kb, (1,), dtype=jnp.float32) * 0.1

    ref = sa_reference(x, conv_w, conv_b)

    # Primary (MXU) path.
    out_mxu = jax.block_until_ready(sa_forward(x, conv_w, conv_b, use_mxu=True))
    assert out_mxu.shape == (B, C, H, W)
    assert jnp.allclose(out_mxu, ref, rtol=1e-4, atol=1e-4), (
        f"MXU path max abs err {jnp.max(jnp.abs(out_mxu - ref))}")

    # Large-HW fallback (roll) path, exercised at the same small shape.
    out_roll = jax.block_until_ready(sa_forward(x, conv_w, conv_b, use_mxu=False))
    assert jnp.allclose(out_roll, ref, rtol=1e-4, atol=1e-4), (
        f"roll path max abs err {jnp.max(jnp.abs(out_roll - ref))}")

    print("KERNEL_OK")
</pallas_src>

<mosaic_0001>
module attributes {stable_mosaic.version = 11 : i64} {
  func.func @sa_kernel_mxu(%arg0: i32, %arg1: memref<512x256xf32, #tpu.memory_space<vmem>>, %arg2: memref<1xf32, #tpu.memory_space<smem>>, %arg3: memref<1x4x256xf32, #tpu.memory_space<vmem>>, %arg4: memref<1x4x256xf32, #tpu.memory_space<vmem>>) attributes {dimension_semantics = [#tpu.dimension_semantics<parallel>], iteration_bounds = array<i64: 2>, scalar_prefetch = 0 : i64, scratch_operands = 0 : i64, tpu.core_type = #tpu.core_type<tc>, window_params = [{pipeline_mode = #tpu.pipeline_mode<synchronous>, transform_indices = @transform_0, window_bounds = array<i64: 512, 256>}, {transform_indices = @transform_1, window_bounds = array<i64: 1>}, {transform_indices = @transform_2, window_bounds = array<i64: 1, 4, 256>}, {transform_indices = @transform_3, window_bounds = array<i64: 1, 4, 256>}]} {
    %c0 = arith.constant 0 : index
    %c0_0 = arith.constant 0 : index
    %c0_1 = arith.constant 0 : index
    %0 = vector.load %arg3[%c0, %c0_0, %c0_1] : memref<1x4x256xf32, #tpu.memory_space<vmem>>, vector<1x4x256xf32>
    %cst = arith.constant dense<0xFF800000> : vector<1x256xf32>
    %1 = vector.multi_reduction <maximumf>, %0, %cst [1] : vector<1x4x256xf32> to vector<1x256xf32>
    %cst_2 = arith.constant dense<0.000000e+00> : vector<1x256xf32>
    %2 = vector.multi_reduction <add>, %0, %cst_2 [1] : vector<1x4x256xf32> to vector<1x256xf32>
    %3 = tpu.concatenate %1, %2 in 1 : vector<1x256xf32>, vector<1x256xf32> -> vector<1x512xf32>
    %c0_3 = arith.constant 0 : index
    %c0_4 = arith.constant 0 : index
    %4 = vector.load %arg1[%c0_3, %c0_4] : memref<512x256xf32, #tpu.memory_space<vmem>>, vector<512x256xf32>
    %cst_5 = arith.constant dense<0.000000e+00> : vector<1x256xf32>
    %5 = tpu.matmul %3, %4, %cst_5 {dimension_numbers = #tpu.dot_dimension_numbers<[1], [0], [0], [1], [0, 0, 1, 1], [], []>} : vector<1x512xf32>, vector<512x256xf32>, vector<1x256xf32> -> vector<1x256xf32>
    %c0_6 = arith.constant 0 : index
    %6 = memref.load %arg2[%c0_6] : memref<1xf32, #tpu.memory_space<smem>>
    %7 = vector.broadcast %6 : f32 to vector<1x256xf32>
    %8 = arith.addf %5, %7 : vector<1x256xf32>
    %cst_7 = arith.constant 0.000000e+00 : f32
    %9 = vector.broadcast %cst_7 : f32 to vector<1x256xf32>
    %10 = arith.maximumf %8, %9 : vector<1x256xf32>
    %c0_8 = arith.constant 0 : index
    %c0_9 = arith.constant 0 : index
    %c0_10 = arith.constant 0 : index
    %11 = vector.load %arg3[%c0_8, %c0_9, %c0_10] : memref<1x4x256xf32, #tpu.memory_space<vmem>>, vector<1x4x256xf32>
    %12 = vector.shape_cast %10 : vector<1x256xf32> to vector<1x1x256xf32>
    %13 = vector.broadcast %12 : vector<1x1x256xf32> to vector<1x4x256xf32>
    %14 = arith.mulf %13, %11 : vector<1x4x256xf32>
    %c0_11 = arith.constant 0 : index
    %c0_12 = arith.constant 0 : index
    %c0_13 = arith.constant 0 : index
    %15 = vector.load %arg4[%c0_11, %c0_12, %c0_13] : memref<1x4x256xf32, #tpu.memory_space<vmem>>, vector<1x4x256xf32>
    tpu.vector_store %arg4[%c0_11, %c0_12, %c0_13], %14 {strides = array<i32>} : memref<1x4x256xf32, #tpu.memory_space<vmem>>, vector<1x4x256xf32>,
    return
  }
  func.func @transform_0(%arg0: i32) -> (i32, i32) {
    %c0_i32 = arith.constant 0 : i32
    %c0_i32_0 = arith.constant 0 : i32
    %c0_i32_1 = arith.constant 0 : i32
    return %c0_i32, %c0_i32_0 : i32, i32
  }
  func.func @transform_1(%arg0: i32) -> i32 {
    %c0_i32 = arith.constant 0 : i32
    %c0_i32_0 = arith.constant 0 : i32
    return %c0_i32 : i32
  }
  func.func @transform_2(%arg0: i32) -> (i32, i32, i32) {
    %c0_i32 = arith.constant 0 : i32
    %c0_i32_0 = arith.constant 0 : i32
    %c0_i32_1 = arith.constant 0 : i32
    return %arg0, %c0_i32, %c0_i32_0 : i32, i32, i32
  }
  func.func @transform_3(%arg0: i32) -> (i32, i32, i32) {
    %c0_i32 = arith.constant 0 : i32
    %c0_i32_0 = arith.constant 0 : i32
    %c0_i32_1 = arith.constant 0 : i32
    return %arg0, %c0_i32, %c0_i32_0 : i32, i32, i32
  }
}

</mosaic_0001>

<bundles_post_ra>
// kernel: tpu_custom_call.1
= control target key start
LH: loop header
LB: loop body
LE: loop exit
PB: predicated region body
PF: predicated region fallthrough
CT: control target
= control target key end

     0   :  { %s1209_s0 = inlined_call_operand.hbm [shape: f32[512,256], index: 0, kind: input, shape index: {}]   ;;  %s1210_s1 = inlined_call_operand.<no memory space> [shape: f32[1], index: 1, kind: input, shape index: {}]   ;;  %s1211_s2 = inlined_call_operand.hbm [shape: f32[2,4,256], index: 2, kind: input, shape index: {}]   ;;  %s1212_s3 = inlined_call_operand.hbm [shape: f32[2,4,256], index: 3, kind: output, shape index: {}]  }
   0x1   :  { %8 = sst [smem:[#allocation2]] %s1210_s1 }
   0x2   :  { %9 = vsyncpa [#allocation4], 0 }
   0x3   :  { %10 = vsyncpa [#allocation7], 0 }
   0x4   :  { %12 = vsyncpa [#allocation7 + $0x1], 0 }
   0x5   :  { %13 = vsyncpa [#allocation5], 0 }
   0x6   :  { %15 = vsyncpa [#allocation5 + $0x1], 0  ;;  %s990_s14 = smov 0   ;;  %s992_s15 = smov 0  }
   0x7   :  { %s994_s16 = smov 0   ;;  %s996_s17 = smov 0  }
   0x8 LB: > { %s1011_s1 = sadd.s32 4294967295, %s960_s17   ;;  %s622_s18 = sadd.s32 4294967294, %s960_s17   ;;  %s960_s17 = sphi %s996_s17, %s1232_s17   ;;  %s956_s16 = sphi %s994_s16, %s1231_s16   ;;  %s952_s15 = sphi %s992_s15, %s1230_s15   ;;  %s948_s14 = sphi %s990_s14, %s1229_s14  }
   0x9   : > { %p83_p0 = scmp.ne.s32.totalorder %s952_s15, %s948_s14  ;;  %p1213_p1 = scmp.eq.s32.totalorder %s1011_s1, 0 }
   0xa   : > { %p113_p3 = scmp.eq.s32.totalorder %s622_s18, 1  ;;  %p623_p5 = scmp.ge.s32.totalorder %s960_s17, 1 }
   0xb   : > { %p1020_p4 = por %p1213_p1, %p83_p0  ;;  %p120_p7 = scmp.lt.s32.totalorder %s960_s17, 3 }
   0xc   : > { %p1025_p6 = por %p113_p3, %p83_p0  ;;  %s962_s22 = smov [#allocation3]  }
   0xd   : > { %s1216_s19 = scalar_select %p1020_p4, 1, 0 }
   0xe   : > { %s1217_s20 = scalar_select %p1025_p6, 1, 0 }
   0xf   : > { %p1030_p8 = pnand %p623_p5, %p120_p7  ;;  %s132_s23 = sshll.u32 %s962_s22, 4  ;;  %s1034_s23 = int_to_ptr.vmem [resolvable:$true] %s132_s23 }
  0x10   : > { %s1046_s25 = sadd.s32 1, %s960_s17   ;;  %s70_s26 = sadd.s32 1, %s956_s16 }
  0x11   : > { %s1218_s21 = scalar_select %p1030_p8, 1, 0 }
  0x12   : > { %p780_p9 = pneg %p1030_p8  ;;  %s67_s27 = ssub.s32 %s960_s17, %s1046_s25 }
  0x13   : > { %s832_s30 = scalar_lea.hbm %s1209_s0, 16384 }
  0x14   : > { %p1041_p11 = pnand %p780_p9, %p1213_p1  ;;  %p833_p12 = scmp.ne.s32.totalorder %s1209_s0, %s832_s30 }
  0x15   : > { %p839_p5 = scmp.lt.u32.totalorder %s832_s30, %s1209_s0 }
  0x16   : > { %p834_p13 = pneg %p1041_p11 }
  0x18   : > { %p835_p0 = pnand %p834_p13, %p833_p12 }
  0x1a   : > { %p836_p3 = pneg %p835_p0 }
  0x1c   : > { %p841_p7 = pnand %p839_p5, %p836_p3 }
  0x1e   : > { %844 = shalt.err (!%p841_p7)
}
  0x1f   : > { %s845_s8 = scalar_lea.vmem %s1034_s23, 16384  ;;  %p853_p2 = scmp.lt.s32.totalorder %s1034_s23, %s1034_s23 }
  0x20   : > { %p846_p9 = scmp.ne.s32.totalorder %s1034_s23, %s845_s8  ;;  %p854_p6 = scmp.lt.s32.totalorder %s845_s8, %s845_s8 }
  0x22   : > { %p848_p10 = pnand %p846_p9, %p834_p13  ;;  %p855_p4 = por %p854_p6, %p853_p2 }
  0x24   : > { %p849_p1 = pneg %p848_p10 }
  0x26   : > { %p856_p8 = pnand %p855_p4, %p849_p1 }
  0x28   : > { %859 = shalt.err (!%p856_p8)
}
  0x29   : > { %s963_s9 = smov 256   ;;  %s964_s10 = smov 16  }
  0x2a   : > { %783 = dma.hbm_to_vmem [thread:$0]  (!%p1041_p11), %s1209_s0, 16384, %s1034_s23, [#allocation4], %s963_s9, %s963_s9, %s964_s10  }
  0x2b   : > { %p68_p2 = scmp.eq.s32.totalorder %s67_s27, 0  ;;  %p77_p1 = scmp.ne.s32.totalorder %s956_s16, %s952_s15 }
  0x2c   : > { %p78_p4 = scmp.eq.s32.totalorder %s960_s17, 0  ;;  %p793_p6 = scmp.lt.s32.totalorder %s960_s17, 2 }
  0x2d   : > { %s1077_s13 = scalar_select %p68_p2, %s956_s16, %s70_s26  }
  0x2e   : > { %p79_p8 = por %p78_p4, %p77_p1  ;;  %p1220_p10 = scmp.eq.s32.totalorder %s1011_s1, 1 }
  0x2f   : > { %s149_s22 = sand.u32 1, %s956_s16   ;;  %s638_s28 = sshll.u32 %s960_s17, 7 }
  0x30   : > { %p1081_p12 = por %p1220_p10, %p77_p1  ;;  %s626_s29 = sshll.u32 %s149_s22, 3 }
  0x31   : > { %s1090_s4 = scalar_lea.hbm %s1211_s2, %s638_s28  ;;  %s153_s23 = scalar_lea.vmem [#allocation6], %s626_s29 }
  0x32   : > { %s161_s26 = sshll.u32 %s153_s23, 4  ;;  %p1092_p11 = pnand %p793_p6, %p79_p8  ;;  %s1096_s26 = int_to_ptr.vmem [resolvable:$true] %s161_s26 }
  0x33   : > { %s150_s5 = scalar_lea.sflag [#allocation7], %s149_s22  ;;  %s860_s6 = scalar_lea.hbm %s1090_s4, 128 }
  0x34   : > { %p861_p13 = scmp.ne.s32.totalorder %s1090_s4, %s860_s6  ;;  %p862_p0 = pneg %p1092_p11 }
  0x35   : > { %s865_s9 = scalar_lea.hbm %s1211_s2, 256  ;;  %p866_p7 = scmp.lt.u32.totalorder %s1090_s4, %s1211_s2 }
  0x36   : > { %p863_p3 = pnand %p862_p0, %p861_p13  ;;  %p867_p9 = scmp.lt.u32.totalorder %s865_s9, %s860_s6 }
  0x37   : > { %p869_p1 = scmp.lt.u32.totalorder %s860_s6, %s1090_s4 }
  0x38   : > { %p864_p5 = pneg %p863_p3  ;;  %p868_p2 = por %p867_p9, %p866_p7 }
  0x3a   : > { %p870_p4 = por %p869_p1, %p868_p2 }
  0x3c   : > { %p871_p6 = pnand %p870_p4, %p864_p5 }
  0x3e   : > { %874 = shalt.err (!%p871_p6)
}
  0x3f   : > { %s875_s12 = scalar_lea.vmem %s1096_s26, 128  ;;  %s965_s22 = smov [#allocation6]  }
  0x40   : > { %p876_p8 = scmp.ne.s32.totalorder %s1096_s26, %s875_s12  ;;  %s880_s28 = sshll.u32 %s965_s22, 4  ;;  %s881_s28 = int_to_ptr.vmem [resolvable:$false] %s880_s28 }
  0x41   : > { %s882_s29 = scalar_lea.vmem %s881_s28, 256  ;;  %p883_p3 = scmp.lt.s32.totalorder %s1096_s26, %s881_s28 }
  0x42   : > { %p878_p10 = pnand %p876_p8, %p862_p0  ;;  %p884_p7 = scmp.lt.s32.totalorder %s882_s29, %s875_s12 }
  0x44   : > { %p879_p13 = pneg %p878_p10  ;;  %p885_p9 = por %p884_p7, %p883_p3 }
  0x46   : > { %p886_p2 = pnand %p885_p9, %p879_p13 }
  0x48   : > { %889 = shalt.err (!%p886_p2)
}
  0x49   : > { %787 = dma.hbm_to_vmem [thread:$0]  (!%p1092_p11), %s1090_s4, 128, %s1096_s26, %s150_s5  }
  0x4a   : > { %p1223_p5 = scmp.ne.s32.totalorder %s1218_s21, 0 }
  0x4b   : > { %p1224_p0 = scmp.eq.s32.totalorder (!%p1223_p5), %s1011_s1, 0 }
  0x4c   : > { %170 = sbr.rel (%p1223_p5) target bundleno = 394 (0x18a), region = 32 }
  0x53   : > { %935 = dma.done.wait (%p1224_p0), [#allocation4], 16384   ;;  %p1225_p1 = pmov %p1224_p0 }
  0x54   : > { %s1130_s24 = sand.u32 1, %s952_s15   ;;  %p1226_p11 = scmp.ne.s32.totalorder %s1216_s19, 0 }
  0x55   : > { %937 = vsyncadd (%p1225_p1), [#allocation4], 4294950912  ;;  %s631_s30 = sshll.u32 %s1130_s24, 3  ;;  %s177_s23 = scalar_lea.sflag [#allocation7], %s1130_s24 }
  0x56   : > { %s1136_s4 = scalar_lea.vmem [#allocation6], %s631_s30 }
  0x57   : > { %939 = dma.done.wait (%p1226_p11), %s177_s23, 128  }
  0x58   : > { %941 = vsyncadd (%p1226_p11), %s177_s23, 4294967168  ;;  %v237_v0 = vld [vmem:[#allocation3 + $0x8] sm:$0xff]  ;;  %v239_v1 = vld [vmem:[#allocation3 + $0x18] sm:$0xff]  ;;  %vm207_vm0 = vcmask 1043456   ;;  %s364_s19 = sld [smem:[#allocation2]]  ;;  %s639_s21 = sshll.u32 %s1011_s1, 7 }
  0x59   : > { %v236_v2 = vld [vmem:[#allocation3] sm:$0xff]  ;;  %v640_v3 = vpack.c.bf16 %v239_v1, %v237_v0  ;;  %v238_v4 = vld [vmem:[#allocation3 + $0x10] sm:$0xff]  ;;  %v301_v5 = vld [vmem:[#allocation3 + $0x208] sm:$0xff]  ;;  %s202_s26 = scalar_lea.vmem [#allocation8], %s631_s30  ;;  %s1165_s7 = scalar_lea.hbm %s1212_s3, %s639_s21 }
  0x5a   : > { %v303_v6 = vld [vmem:[#allocation3 + $0x218] sm:$0xff]  ;;  %v642_v7 = vpack.c.bf16 %v238_v4, %v236_v2  ;;  %v300_v9 = vld [vmem:[#allocation3 + $0x200] sm:$0xff]  ;;  %v302_v10 = vld [vmem:[#allocation3 + $0x210] sm:$0xff]  ;;  %s540_s27 = sshll.u32 %s202_s26, 4  ;;  %s526_s8 = scalar_lea.sflag [#allocation5], %s1130_s24  ;;  %s1167_s27 = int_to_ptr.vmem [resolvable:$true] %s540_s27 }
  0x5b   : > { %v704_v8 = vpack.c.bf16 %v303_v6, %v301_v5  ;;  %v241_v11 = vld [vmem:[#allocation3 + $0x28] sm:$0xff]  ;;  %641 = vmatprep.subr.bf16.mxu1 %v640_v3  ;;  %v706_v12 = vpack.c.bf16 %v302_v10, %v300_v9  ;;  %v243_v13 = vld [vmem:[#allocation3 + $0x38] sm:$0xff]  ;;  %v240_v14 = vld [vmem:[#allocation3 + $0x20] sm:$0xff]  ;;  %s890_s9 = scalar_lea.vmem %s1167_s27, 128  ;;  %s966_s1 = smov [#allocation8]  }
  0x5c   : > { %v242_v15 = vld [vmem:[#allocation3 + $0x30] sm:$0xff]  ;;  %643 = vmatpush1.bf16.msra.mxu1 %v642_v7  ;;  %v644_v16 = vpack.c.bf16 %v243_v13, %v241_v11  ;;  %v305_v18 = vld [vmem:[#allocation3 + $0x228] sm:$0xff]  ;;  %v307_v19 = vld [vmem:[#allocation3 + $0x238] sm:$0xff]  ;;  %p891_p4 = scmp.ne.s32.totalorder %s1167_s27, %s890_s9  ;;  %s894_s10 = sshll.u32 %s966_s1, 4  ;;  %s895_s10 = int_to_ptr.vmem [resolvable:$false] %s894_s10 }
  0x5d   : > { %705 = vmatprep.subr.bf16.mxu0 %v704_v8  ;;  %v646_v17 = vpack.c.bf16 %v242_v15, %v240_v14  ;;  %v304_v20 = vld [vmem:[#allocation3 + $0x220] sm:$0xff]  ;;  %v708_v21 = vpack.c.bf16 %v307_v19, %v305_v18  ;;  %v306_v22 = vld [vmem:[#allocation3 + $0x230] sm:$0xff]  ;;  %v245_v23 = vld [vmem:[#allocation3 + $0x48] sm:$0xff]  ;;  %s896_s11 = scalar_lea.vmem %s895_s10, 256  ;;  %p897_p10 = scmp.lt.s32.totalorder %s1167_s27, %s895_s10 }
  0x5e   : > { %707 = vmatpush1.bf16.msra.mxu0 %v706_v12  ;;  %v247_v24 = vld [vmem:[#allocation3 + $0x58] sm:$0xff]  ;;  %645 = vmatprep.subr.bf16.mxu1 %v644_v16  ;;  %v710_v25 = vpack.c.bf16 %v306_v22, %v304_v20  ;;  %v244_v27 = vld [vmem:[#allocation3 + $0x40] sm:$0xff]  ;;  %v246_v28 = vld [vmem:[#allocation3 + $0x50] sm:$0xff]  ;;  %p892_p6 = pnand %p891_p4, %p1081_p12  ;;  %p898_p13 = scmp.lt.s32.totalorder %s896_s11, %s890_s9 }
  0x5f   : > { %v648_v26 = vpack.c.bf16 %v247_v24, %v245_v23  ;;  %v309_v29 = vld [vmem:[#allocation3 + $0x248] sm:$0xff]  ;;  %709 = vmatprep.subr.bf16.mxu0 %v708_v21  ;;  %v311_v30 = vld [vmem:[#allocation3 + $0x258] sm:$0xff]  ;;  %v308_v31 = vld [vmem:[#allocation3 + $0x240] sm:$0xff]  ;;  %v650_v33 = vpack.c.bf16 %v246_v28, %v244_v27 }
  0x60   : > { %v310_v32 = vld [vmem:[#allocation3 + $0x250] sm:$0xff]  ;;  %647 = vmatpush1.bf16.msra.mxu1 %v646_v17  ;;  %v712_v34 = vpack.c.bf16 %v311_v30, %v309_v29  ;;  %v249_v35 = vld [vmem:[#allocation3 + $0x68] sm:$0xff]  ;;  %v251_v36 = vld [vmem:[#allocation3 + $0x78] sm:$0xff]  ;;  %p893_p8 = pneg %p892_p6  ;;  %p899_p3 = por %p898_p13, %p897_p10 }
  0x61   : > { %v248_v37 = vld [vmem:[#allocation3 + $0x60] sm:$0xff]  ;;  %649 = vmatprep.subr.bf16.mxu1 %v648_v26  ;;  %v714_v38 = vpack.c.bf16 %v310_v32, %v308_v31  ;;  %v652_v39 = vpack.c.bf16 %v251_v36, %v249_v35  ;;  %v250_v40 = vld [vmem:[#allocation3 + $0x70] sm:$0xff]  ;;  %v313_v41 = vld [vmem:[#allocation3 + $0x268] sm:$0xff] }
  0x62   : > { %711 = vmatpush1.bf16.msra.mxu0 %v710_v25  ;;  %v315_v42 = vld [vmem:[#allocation3 + $0x278] sm:$0xff]  ;;  %v312_v44 = vld [vmem:[#allocation3 + $0x260] sm:$0xff]  ;;  %v314_v45 = vld [vmem:[#allocation3 + $0x270] sm:$0xff]  ;;  %v654_v48 = vpack.c.bf16 %v250_v40, %v248_v37  ;;  %p900_p7 = pnand %p899_p3, %p893_p8 }
  0x63   : > { %713 = vmatprep.subr.bf16.mxu0 %v712_v34  ;;  %v716_v43 = vpack.c.bf16 %v315_v42, %v313_v41  ;;  %v253_v46 = vld [vmem:[#allocation3 + $0x88] sm:$0xff]  ;;  %v255_v47 = vld [vmem:[#allocation3 + $0x98] sm:$0xff]  ;;  %v718_v51 = vpack.c.bf16 %v314_v45, %v312_v44  ;;  %v252_v53 = vld [vmem:[#allocation3 + $0x80] sm:$0xff] }
  0x64   : > { %651 = vmatpush1.bf16.msra.mxu1 %v650_v33  ;;  %v317_v49 = vld [vmem:[#allocation3 + $0x288] sm:$0xff]  ;;  %v319_v50 = vld [vmem:[#allocation3 + $0x298] sm:$0xff]  ;;  %v656_v52 = vpack.c.bf16 %v255_v47, %v253_v46  ;;  %v254_v54 = vld [vmem:[#allocation3 + $0x90] sm:$0xff] }
  0x65   : > { %653 = vmatprep.subr.bf16.mxu1 %v652_v39  ;;  %v316_v55 = vld [vmem:[#allocation3 + $0x280] sm:$0xff]  ;;  %v720_v56 = vpack.c.bf16 %v319_v50, %v317_v49  ;;  %v318_v57 = vld [vmem:[#allocation3 + $0x290] sm:$0xff]  ;;  %v257_v58 = vld [vmem:[#allocation3 + $0xa8] sm:$0xff]  ;;  %v658_v62 = vpack.c.bf16 %v254_v54, %v252_v53 }
  0x66   : > { %715 = vmatpush1.bf16.msra.mxu0 %v714_v38  ;;  %v259_v59 = vld [vmem:[#allocation3 + $0xb8] sm:$0xff]  ;;  %v321_v60 = vld [vmem:[#allocation3 + $0x2a8] sm:$0xff]  ;;  %v722_v63 = vpack.c.bf16 %v318_v57, %v316_v55  ;;  %v256_v1 = vld [vmem:[#allocation3 + $0xa0] sm:$0xff] }
  0x67   : > { %717 = vmatprep.subr.bf16.mxu0 %v716_v43  ;;  %v323_v61 = vld [vmem:[#allocation3 + $0x2b8] sm:$0xff]  ;;  %v660_v0 = vpack.c.bf16 %v259_v59, %v257_v58  ;;  %v258_v2 = vld [vmem:[#allocation3 + $0xb0] sm:$0xff]  ;;  %v320_v3 = vld [vmem:[#allocation3 + $0x2a0] sm:$0xff] }
  0x68   : > { %655 = vmatpush1.bf16.msra.mxu1 %v654_v48  ;;  %v724_v4 = vpack.c.bf16 %v323_v61, %v321_v60  ;;  %v322_v5 = vld [vmem:[#allocation3 + $0x2b0] sm:$0xff]  ;;  %v261_v6 = vld [vmem:[#allocation3 + $0xc8] sm:$0xff]  ;;  %v263_v7 = vld [vmem:[#allocation3 + $0xd8] sm:$0xff]  ;;  %v662_v10 = vpack.c.bf16 %v258_v2, %v256_v1 }
  0x69   : > { %657 = vmatprep.subr.bf16.mxu1 %v656_v52  ;;  %v325_v8 = vld [vmem:[#allocation3 + $0x2c8] sm:$0xff]  ;;  %v327_v9 = vld [vmem:[#allocation3 + $0x2d8] sm:$0xff]  ;;  %v726_v11 = vpack.c.bf16 %v322_v5, %v320_v3  ;;  %v664_v12 = vpack.c.bf16 %v263_v7, %v261_v6  ;;  %v260_v13 = vld [vmem:[#allocation3 + $0xc0] sm:$0xff] }
  0x6a   : > { %719 = vmatpush1.bf16.msra.mxu0 %v718_v51  ;;  %v262_v14 = vld [vmem:[#allocation3 + $0xd0] sm:$0xff]  ;;  %v324_v15 = vld [vmem:[#allocation3 + $0x2c0] sm:$0xff]  ;;  %v728_v16 = vpack.c.bf16 %v327_v9, %v325_v8  ;;  %v265_v18 = vld [vmem:[#allocation3 + $0xe8] sm:$0xff] }
  0x6b   : > { %721 = vmatprep.subr.bf16.mxu0 %v720_v56  ;;  %v326_v17 = vld [vmem:[#allocation3 + $0x2d0] sm:$0xff]  ;;  %v267_v19 = vld [vmem:[#allocation3 + $0xf8] sm:$0xff]  ;;  %v329_v20 = vld [vmem:[#allocation3 + $0x2e8] sm:$0xff]  ;;  %v666_v22 = vpack.c.bf16 %v262_v14, %v260_v13 }
  0x6c   : > { %659 = vmatpush1.bf16.msra.mxu1 %v658_v62  ;;  %v331_v21 = vld [vmem:[#allocation3 + $0x2f8] sm:$0xff]  ;;  %v730_v23 = vpack.c.bf16 %v326_v17, %v324_v15  ;;  %v668_v24 = vpack.c.bf16 %v267_v19, %v265_v18  ;;  %v264_v25 = vld [vmem:[#allocation3 + $0xe0] sm:$0xff]  ;;  %v266_v26 = vld [vmem:[#allocation3 + $0xf0] sm:$0xff] }
  0x6d   : > { %661 = vmatprep.subr.bf16.mxu1 %v660_v0  ;;  %v328_v27 = vld [vmem:[#allocation3 + $0x2e0] sm:$0xff]  ;;  %v732_v28 = vpack.c.bf16 %v331_v21, %v329_v20  ;;  %v330_v29 = vld [vmem:[#allocation3 + $0x2f0] sm:$0xff]  ;;  %v269_v30 = vld [vmem:[#allocation3 + $0x108] sm:$0xff]  ;;  %v670_v34 = vpack.c.bf16 %v266_v26, %v264_v25 }
  0x6e   : > { %723 = vmatpush1.bf16.msra.mxu0 %v722_v63  ;;  %v271_v31 = vld [vmem:[#allocation3 + $0x118] sm:$0xff]  ;;  %v333_v32 = vld [vmem:[#allocation3 + $0x308] sm:$0xff]  ;;  %v734_v35 = vpack.c.bf16 %v330_v29, %v328_v27  ;;  %v268_v37 = vld [vmem:[#allocation3 + $0x100] sm:$0xff] }
  0x6f   : > { %725 = vmatprep.subr.bf16.mxu0 %v724_v4  ;;  %v335_v33 = vld [vmem:[#allocation3 + $0x318] sm:$0xff]  ;;  %v672_v36 = vpack.c.bf16 %v271_v31, %v269_v30  ;;  %v270_v38 = vld [vmem:[#allocation3 + $0x110] sm:$0xff]  ;;  %v332_v39 = vld [vmem:[#allocation3 + $0x300] sm:$0xff] }
  0x70   : > { %663 = vmatpush1.bf16.msra.mxu1 %v662_v10  ;;  %v736_v40 = vpack.c.bf16 %v335_v33, %v333_v32  ;;  %v334_v41 = vld [vmem:[#allocation3 + $0x310] sm:$0xff]  ;;  %v273_v42 = vld [vmem:[#allocation3 + $0x128] sm:$0xff]  ;;  %v275_v43 = vld [vmem:[#allocation3 + $0x138] sm:$0xff]  ;;  %v674_v46 = vpack.c.bf16 %v270_v38, %v268_v37 }
  0x71   : > { %665 = vmatprep.subr.bf16.mxu1 %v664_v12  ;;  %v337_v44 = vld [vmem:[#allocation3 + $0x328] sm:$0xff]  ;;  %v339_v45 = vld [vmem:[#allocation3 + $0x338] sm:$0xff]  ;;  %v738_v47 = vpack.c.bf16 %v334_v41, %v332_v39  ;;  %v676_v48 = vpack.c.bf16 %v275_v43, %v273_v42  ;;  %v272_v49 = vld [vmem:[#allocation3 + $0x120] sm:$0xff] }
  0x72   : > { %727 = vmatpush1.bf16.msra.mxu0 %v726_v11  ;;  %v274_v50 = vld [vmem:[#allocation3 + $0x130] sm:$0xff]  ;;  %v336_v51 = vld [vmem:[#allocation3 + $0x320] sm:$0xff]  ;;  %v740_v52 = vpack.c.bf16 %v339_v45, %v337_v44  ;;  %v277_v54 = vld [vmem:[#allocation3 + $0x148] sm:$0xff] }
  0x73   : > { %729 = vmatprep.subr.bf16.mxu0 %v728_v16  ;;  %v338_v53 = vld [vmem:[#allocation3 + $0x330] sm:$0xff]  ;;  %v279_v55 = vld [vmem:[#allocation3 + $0x158] sm:$0xff]  ;;  %v341_v56 = vld [vmem:[#allocation3 + $0x348] sm:$0xff]  ;;  %v678_v58 = vpack.c.bf16 %v274_v50, %v272_v49 }
  0x74   : > { %667 = vmatpush1.bf16.msra.mxu1 %v666_v22  ;;  %v343_v57 = vld [vmem:[#allocation3 + $0x358] sm:$0xff]  ;;  %v742_v59 = vpack.c.bf16 %v338_v53, %v336_v51  ;;  %v680_v60 = vpack.c.bf16 %v279_v55, %v277_v54  ;;  %v276_v61 = vld [vmem:[#allocation3 + $0x140] sm:$0xff]  ;;  %v278_v62 = vld [vmem:[#allocation3 + $0x150] sm:$0xff] }
  0x75   : > { %669 = vmatprep.subr.bf16.mxu1 %v668_v24  ;;  %v340_v63 = vld [vmem:[#allocation3 + $0x340] sm:$0xff]  ;;  %v744_v0 = vpack.c.bf16 %v343_v57, %v341_v56  ;;  %v342_v1 = vld [vmem:[#allocation3 + $0x350] sm:$0xff]  ;;  %v281_v2 = vld [vmem:[#allocation3 + $0x168] sm:$0xff]  ;;  %v682_v6 = vpack.c.bf16 %v278_v62, %v276_v61 }
  0x76   : > { %731 = vmatpush1.bf16.msra.mxu0 %v730_v23  ;;  %v283_v3 = vld [vmem:[#allocation3 + $0x178] sm:$0xff]  ;;  %v345_v4 = vld [vmem:[#allocation3 + $0x368] sm:$0xff]  ;;  %v280_v7 = vld [vmem:[#allocation3 + $0x160] sm:$0xff]  ;;  %v746_v8 = vpack.c.bf16 %v342_v1, %v340_v63 }
  0x77   : > { %733 = vmatprep.subr.bf16.mxu0 %v732_v28  ;;  %v347_v5 = vld [vmem:[#allocation3 + $0x378] sm:$0xff]  ;;  %v684_v9 = vpack.c.bf16 %v283_v3, %v281_v2  ;;  %v282_v10 = vld [vmem:[#allocation3 + $0x170] sm:$0xff]  ;;  %v344_v11 = vld [vmem:[#allocation3 + $0x360] sm:$0xff] }
  0x78   : > { %671 = vmatpush1.bf16.msra.mxu1 %v670_v34  ;;  %v346_v12 = vld [vmem:[#allocation3 + $0x370] sm:$0xff]  ;;  %v748_v13 = vpack.c.bf16 %v347_v5, %v345_v4  ;;  %v285_v14 = vld [vmem:[#allocation3 + $0x188] sm:$0xff]  ;;  %v287_v15 = vld [vmem:[#allocation3 + $0x198] sm:$0xff]  ;;  %v686_v22 = vpack.c.bf16 %v282_v10, %v280_v7 }
  0x79   : > { %673 = vmatprep.subr.bf16.mxu1 %v672_v36  ;;  %v1143_v16 = vld [vmem:[%s1136_s4] sm:$0xff]  ;;  %v351_v18 = vld [vmem:[#allocation3 + $0x398] sm:$0xff]  ;;  %v750_v25 = vpack.c.bf16 %v346_v12, %v344_v11  ;;  %v688_v26 = vpack.c.bf16 %v287_v15, %v285_v14  ;;  %v286_v28 = vld [vmem:[#allocation3 + $0x190] sm:$0xff] }
  0x7a   : > { %735 = vmatpush1.bf16.msra.mxu0 %v734_v35  ;;  %v349_v17 = vld [vmem:[#allocation3 + $0x388] sm:$0xff]  ;;  %v1147_v19 = vcombine.high %v1143_v16, %v1143_v16  ;;  %v208_v20 = vsel %vm207_vm0, %v1143_v16, -inf  ;;  %v222_v21 = vsel %vm207_vm0, %v1143_v16, 0.0  ;;  %v284_v27 = vld [vmem:[#allocation3 + $0x180] sm:$0xff]  ;;  %v350_v33 = vld [vmem:[#allocation3 + $0x390] sm:$0xff] }
  0x7b   : > { %737 = vmatprep.subr.bf16.mxu0 %v736_v40  ;;  %v209_v23 = vrot.slane %v208_v20, 4  ;;  %v223_v24 = vrot.slane %v222_v21, 4  ;;  %v348_v29 = vld [vmem:[#allocation3 + $0x380] sm:$0xff]  ;;  %v752_v32 = vpack.c.bf16 %v351_v18, %v349_v17  ;;  %v289_v34 = vld [vmem:[#allocation3 + $0x1a8] sm:$0xff]  ;;  %v291_v35 = vld [vmem:[#allocation3 + $0x1b8] sm:$0xff]  ;;  %v690_v41 = vpack.c.bf16 %v286_v28, %v284_v27 }
  0x7c   : > { %675 = vmatpush1.bf16.msra.mxu1 %v674_v46  ;;  %v215_v30 = vsel %vm207_vm0, %v1147_v19, -inf  ;;  %v229_v31 = vsel %vm207_vm0, %v1147_v19, 0.0  ;;  %v353_v38 = vld [vmem:[#allocation3 + $0x3a8] sm:$0xff]  ;;  %v355_v39 = vld [vmem:[#allocation3 + $0x3b8] sm:$0xff]  ;;  %v754_v45 = vpack.c.bf16 %v350_v33, %v348_v29  ;;  %v692_v46 = vpack.c.bf16 %v291_v35, %v289_v34  ;;  %v352_v49 = vld [vmem:[#allocation3 + $0x3a0] sm:$0xff] }
  0x7d   : > { %677 = vmatprep.subr.bf16.mxu1 %v676_v48  ;;  %v216_v36 = vrot.slane %v215_v30, 4  ;;  %v230_v37 = vrot.slane %v229_v31, 4  ;;  %v210_v40 = vmax.f32 %v208_v20, %v209_v23  ;;  %v224_v44 = vadd.f32 %v223_v24, %v222_v21  ;;  %v290_v48 = vld [vmem:[#allocation3 + $0x1b0] sm:$0xff]  ;;  %v295_v53 = vld [vmem:[#allocation3 + $0x1d8] sm:$0xff]  ;;  %v357_v56 = vld [vmem:[#allocation3 + $0x3c8] sm:$0xff] }
  0x7e   : > { %739 = vmatpush1.bf16.msra.mxu0 %v738_v47  ;;  %v288_v47 = vld [vmem:[#allocation3 + $0x1a0] sm:$0xff]  ;;  %v756_v50 = vpack.c.bf16 %v355_v39, %v353_v38  ;;  %v354_v51 = vld [vmem:[#allocation3 + $0x3b0] sm:$0xff]  ;;  %v359_v57 = vld [vmem:[#allocation3 + $0x3d8] sm:$0xff]  ;;  %v365_v33 = vstv %s364_s19 }
  0x7f   : > { %741 = vmatprep.subr.bf16.mxu0 %v740_v52  ;;  %v217_v42 = vmax.f32 %v215_v30, %v216_v36  ;;  %v231_v43 = vadd.f32 %v230_v37, %v229_v31  ;;  %v293_v52 = vld [vmem:[#allocation3 + $0x1c8] sm:$0xff]  ;;  %v225_v62 = vrot.slane %v224_v44, 2  ;;  %v758_v63 = vpack.c.bf16 %v354_v51, %v352_v49  ;;  %v292_v1 = vld [vmem:[#allocation3 + $0x1c0] sm:$0xff]  ;;  %v294_v2 = vld [vmem:[#allocation3 + $0x1d0] sm:$0xff] }
  0x80   : > { %679 = vmatpush1.bf16.msra.mxu1 %v678_v58  ;;  %v211_v58 = vrot.slane %v210_v40, 2  ;;  %v356_v3 = vld [vmem:[#allocation3 + $0x3c0] sm:$0xff]  ;;  %v760_v4 = vpack.c.bf16 %v359_v57, %v357_v56  ;;  %v358_v5 = vld [vmem:[#allocation3 + $0x3d0] sm:$0xff]  ;;  %v299_v7 = vld [vmem:[#allocation3 + $0x1f8] sm:$0xff] }
  0x81   : > { %681 = vmatprep.subr.bf16.mxu1 %v680_v60  ;;  %v218_v54 = vrot.slane %v217_v42, 2  ;;  %v232_v55 = vrot.slane %v231_v43, 2  ;;  %v361_v10 = vld [vmem:[#allocation3 + $0x3e8] sm:$0xff]  ;;  %v363_v11 = vld [vmem:[#allocation3 + $0x3f8] sm:$0xff]  ;;  %v226_v17 = vadd.f32 %v225_v62, %v224_v44  ;;  %v762_v18 = vpack.c.bf16 %v358_v5, %v356_v3  ;;  %v296_v21 = vld [vmem:[#allocation3 + $0x1e0] sm:$0xff] }
  0x82   : > { %743 = vmatpush1.bf16.msra.mxu0 %v742_v59  ;;  %v694_v59 = vpack.c.bf16 %v290_v48, %v288_v47  ;;  %v212_v12 = vmax.f32 %v210_v40, %v211_v58  ;;  %v764_v23 = vpack.c.bf16 %v363_v11, %v361_v10  ;;  %v360_v24 = vld [vmem:[#allocation3 + $0x3e0] sm:$0xff] }
  0x83   : > { %745 = vmatprep.subr.bf16.mxu0 %v744_v0  ;;  %v219_v60 = vmax.f32 %v217_v42, %v218_v54  ;;  %v233_v61 = vadd.f32 %v232_v55, %v231_v43  ;;  %v696_v0 = vpack.c.bf16 %v295_v53, %v293_v52  ;;  %v227_v28 = vrot.slane %v226_v17, 1 }
  0x84   : > { %683 = vmatpush1.bf16.msra.mxu1 %v682_v6  ;;  %v297_v6 = vld [vmem:[#allocation3 + $0x1e8] sm:$0xff] }
  0x85   : > { %685 = vmatprep.subr.bf16.mxu1 %v684_v9  ;;  %v234_v9 = vrot.slane %v233_v61, 1  ;;  %v700_v20 = vpack.c.bf16 %v299_v7, %v297_v6  ;;  %v228_v31 = vadd.f32 %v227_v28, %v226_v17 }
  0x86   : > { %747 = vmatpush1.bf16.msra.mxu0 %v746_v8  ;;  %v220_v8 = vrot.slane %v219_v60, 1 }
  0x87   : > { %749 = vmatprep.subr.bf16.mxu0 %v748_v13  ;;  %v698_v13 = vpack.c.bf16 %v294_v2, %v292_v1  ;;  %v235_v15 = vadd.f32 %v234_v9, %v233_v61 }
  0x88   : > { %687 = vmatpush1.bf16.msra.mxu1 %v686_v22  ;;  %v221_v14 = vmax.f32 %v219_v60, %v220_v8  ;;  %v298_v22 = vld [vmem:[#allocation3 + $0x1f0] sm:$0xff] }
  0x89   : > { %689 = vmatprep.subr.bf16.mxu1 %v688_v26  ;;  %v213_v26 = vrot.slane %v212_v12, 1  ;;  %501 = vmatprep.mubr.f32.mxu0 %v235_v15  ;;  %v702_v27 = vpack.c.bf16 %v298_v22, %v296_v21 }
  0x8a   : > { %751 = vmatpush1.bf16.msra.mxu0 %v750_v25  ;;  %v362_v25 = vld [vmem:[#allocation3 + $0x3f0] sm:$0xff]  ;;  %430 = vmatprep.mubr.f32.mxu1 %v221_v14 }
  0x8b   : > { %753 = vmatprep.subr.bf16.mxu0 %v752_v32  ;;  %v766_v29 = vpack.c.bf16 %v362_v25, %v360_v24  ;;  %v214_v30 = vmax.f32 %v212_v12, %v213_v26  ;;  %v510_v32 = vlaneseq }
  0x8c   : > { %691 = vmatpush1.bf16.msra.mxu1 %v690_v41 }
  0x8d   : > { %693 = vmatprep.subr.bf16.mxu1 %v692_v46  ;;  %v511_v34 = vshrl.u32 %v510_v32, 7 }
  0x8e   : > { %755 = vmatpush1.bf16.msra.mxu0 %v754_v45 }
  0x8f   : > { %757 = vmatprep.subr.bf16.mxu0 %v756_v50  ;;  %v512_v42 = vsub.s32 0, %v511_v34 }
  0x90   : > { %695 = vmatpush1.bf16.msra.mxu1 %v694_v59 }
  0x91   : > { %697 = vmatprep.subr.bf16.mxu1 %v696_v0 }
  0x92   : > { %759 = vmatpush1.bf16.msra.mxu0 %v758_v63 }
  0x93   : > { %761 = vmatprep.subr.bf16.mxu0 %v760_v4 }
  0x94   : > { %699 = vmatpush1.bf16.msra.mxu1 %v698_v13 }
  0x95   : > { %701 = vmatprep.subr.bf16.mxu1 %v700_v20 }
  0x96   : > { %763 = vmatpush1.bf16.msra.mxu0 %v762_v18 }
  0x97   : > { %765 = vmatprep.subr.bf16.mxu0 %v764_v23 }
  0x98   : > { %703 = vmatpush1.bf16.msra.mxu1 %v702_v27 }
  0x9a   : > { %767 = vmatpush1.bf16.msra.mxu0 %v766_v29 }
  0x9b   : > { %431 = vmatmul.mubr.f32.vlgmr.msra.gmra.mrb[0].mxu1 %v214_v30 }
  0x9d   : > { %502 = vmatmul.mubr.f32.vlgmr.msra.gmra.mrb[0].mxu0 %v228_v31 }
 0x16e   : > { %v432_v35 = vpop.f32.mrb[0].mxu1 }
 0x16f   : > { %v433_v36 = vadd.f32 %v432_v35, %v365_v33  ;;  %v434_v37 = vpop.f32.mrb[1].mxu1 }
 0x170   : > { %v503_v38 = vpop.f32.mrb[0].mxu0  ;;  %v435_v39 = vadd.f32 %v434_v37, %v365_v33 }
 0x171   : > { %v505_v40 = vpop.f32.mrb[1].mxu0  ;;  %v504_v41 = vadd.f32 %v503_v38, %v433_v36 }
 0x172   : > { %v506_v43 = vadd.f32 %v505_v40, %v435_v39 }
 0x173   : > { %v508_v44 = vmax.f32 %v504_v41, 0.0 }
 0x174   : > { %v509_v45 = vmax.f32 %v506_v43, 0.0 }
 0x175   : > { %v513_v46 = vrot.slane %v508_v44, %v512_v42 }
 0x176   : > { %v517_v47 = vrot.slane %v509_v45, %v512_v42 }
 0x177   : > { %v518_v48 = vmul.f32 %v513_v46, %v1143_v16 }
 0x178   : > { %v519_v49 = vmul.f32 %v517_v47, %v1147_v19 }
 0x17a   : > { %v522_v50 = vcombine.low %v518_v48, %v519_v49 }
 0x17c   : > { %524 = vst [vmem:[%s202_s26] sm:$0xff] %v522_v50 }
 0x17d   : > { %903 = shalt.err (!%p900_p7)
}
 0x17e   : > { %s904_s12 = scalar_lea.hbm %s1165_s7, 128  ;;  %s908_s29 = scalar_lea.hbm %s1212_s3, 256 }
 0x17f   : > { %p905_p9 = scmp.ne.s32.totalorder %s1165_s7, %s904_s12  ;;  %p909_p0 = scmp.lt.u32.totalorder %s1165_s7, %s1212_s3 }
 0x180   : > { %p910_p1 = scmp.lt.u32.totalorder %s908_s29, %s904_s12  ;;  %p912_p4 = scmp.lt.u32.totalorder %s904_s12, %s1165_s7 }
 0x181   : > { %p906_p2 = pnand %p905_p9, %p1081_p12 }
 0x182   : > { %p911_p11 = por %p910_p1, %p909_p0 }
 0x183   : > { %p907_p5 = pneg %p906_p2 }
 0x184   : > { %p913_p6 = por %p912_p4, %p911_p11 }
 0x186   : > { %p914_p8 = pnand %p913_p6, %p907_p5 }
 0x188   : > { %917 = shalt.err (!%p914_p8)
}
 0x189   : > { %778 = dma.vmem_to_hbm [thread:$0]  (%p1081_p12), %s1167_s27, 128, %s1165_s7, %s526_s8  }
 0x18a PF: > { %s552_s23 = sand.u32 1, %s948_s14   ;;  %p1227_p10 = scmp.ne.s32.totalorder %s1217_s20, 0 }
 0x18b   : > { %p1228_p13 = scmp.ge.s32.totalorder %s960_s17, 2  ;;  %s553_s4 = scalar_lea.sflag [#allocation5], %s552_s23 }
 0x18d   : > { %p789_p3 = pnand %p1228_p13, %p1227_p10 }
 0x18f   : > { %943 = dma.done.wait (!%p789_p3), %s553_s4, 128  }
 0x190   : > { %945 = vsyncadd (!%p789_p3), %s553_s4, 4294967168  ;;  %p18_p7 = scmp.ge.s32.totalorder %s1046_s25, 4   ;;  %s1229_s14 = smov %s952_s15 }
 0x191   : > { %s1230_s15 = smov %s956_s16  ;;  %s1231_s16 = smov %s1077_s13 }
 0x192   : > { %s1232_s17 = smov %s1046_s25  ;;  %20 = sbr.rel (!%p18_p7) target bundleno = 8 (0x8), region = 82 }
 0x199   :  { %558 = vsyncpa [#allocation4], 1 }
 0x19a   :  { %560 = vsyncpa [#allocation4 + $0x1], 1 }
 0x19b   :  { %561 = vsyncpa [#allocation7], 1 }
 0x19c   :  { %563 = vsyncpa [#allocation7 + $0x1], 1 }
 0x19d   :  { %564 = vsyncpa [#allocation5], 1 }
 0x19e   :  { %566 = vsyncpa [#allocation5 + $0x1], 1 }

</bundles_post_ra>
